<compile_context>
chip_gen: v6e
topology: v6e:2x2x1
jax: 0.10.0
libtpu: 0.0.40
codegen_flags: <defaults>
</compile_context>

<pallas_src>
import functools

import jax
import jax.numpy as jnp
from jax.experimental import pallas as pl
from jax.experimental.pallas import tpu as pltpu

LN_EPS = 1e-5
LANE = 128


def _sage_relu_ln(a_cnt, inv_deg, h, wlr, b, g, beta, d_valid):
    """One SAGEConv(mean) + ReLU + LayerNorm layer on VMEM-resident values.

    wlr = [Wl | Wr] concatenated along the output dim (one MXU pass).  The
    neighbor branch is reassociated as (A_cnt @ (h @ Wl)) * inv_deg so the
    row-normalization (1/in_degree) stays in f32.  Trailing (LANE - d_valid)
    feature lanes are structural zero padding (zero weight columns, bias,
    gamma, beta); LayerNorm statistics use only the first d_valid features.
    """
    ts = jnp.dot(h, wlr, preferred_element_type=jnp.float32)        # (N, 2*LANE)
    t = ts[:, :LANE]                                                 # h @ Wl
    s = ts[:, LANE:]                                                 # h @ Wr

    agg = jnp.dot(a_cnt, t.astype(jnp.bfloat16),
                  preferred_element_type=jnp.float32) * inv_deg      # mean agg, f32 scale

    z = jnp.maximum(agg + s + b, 0.0)                                # ReLU, f32

    inv_d = 1.0 / float(d_valid)
    # padded lanes are exactly zero, so full-width sums equal valid-lane sums
    mean = jnp.sum(z, axis=-1, keepdims=True) * inv_d
    c = z - mean
    var = jnp.sum(c * c, axis=-1, keepdims=True) * inv_d
    if LANE != d_valid:
        # each of the (LANE - d_valid) zero pad lanes contributed (0 - mean)^2
        var = var - (float(LANE - d_valid) * inv_d) * (mean * mean)
    zn = c * jax.lax.rsqrt(var + LN_EPS)
    return zn * g + beta                                             # pad lanes -> exactly 0


def _mbgcn_fused_kernel(a_ref, invdeg_ref, x_ref, w_ref, p_ref, o_ref, *,
                        d_valids, w_offsets, d_ins):
    a = a_ref[...]          # (N, N)    bf16 edge counts (exact small integers)
    inv_deg = invdeg_ref[...]   # (N, 1) f32 inverse in-degree (0 if isolated)
    p = p_ref[...]          # (9, 128)  f32 [b, gamma, beta] x 3 layers

    h = x_ref[...]          # (N, 256)  bf16 node features
    n_layers = len(d_valids)
    for li in range(n_layers):
        r0, din = w_offsets[li], d_ins[li]
        wlr = w_ref[r0:r0 + din, :]                  # (din, 256) bf16 [Wl | Wr]
        b    = p[3 * li + 0:3 * li + 1, :]
        g    = p[3 * li + 1:3 * li + 2, :]
        beta = p[3 * li + 2:3 * li + 3, :]
        h = _sage_relu_ln(a, inv_deg, h, wlr, b, g, beta, d_valids[li])
        if li + 1 < n_layers:
            h = h.astype(jnp.bfloat16)               # bf16 MXU operand next layer

    o_ref[...] = h.astype(o_ref.dtype)               # lane-dense (N, 128) unmasked store


def mbgcn_fused_forward(A_cnt, inv_deg, x, params):
    """gcn1->relu1->gcn2->relu2->gcn3->relu3 in a single pallas_call."""
    N = x.shape[0]
    d_out_final = params[-1]["Wl"].shape[1]          # 64

    # --- pack [Wl | Wr] per layer into one bf16 slab (rows = padded Din) ---
    w_blocks, w_offsets, d_ins, d_valids = [], [], [], []
    row = 0
    for li, pm in enumerate(params):
        din_v, dout_v = pm["Wl"].shape
        din_p = din_v if li == 0 else LANE           # intermediates padded to 128 lanes
        wl = jnp.zeros((din_p, LANE), jnp.float32).at[:din_v, :dout_v].set(pm["Wl"])
        wr = jnp.zeros((din_p, LANE), jnp.float32).at[:din_v, :dout_v].set(pm["Wr"])
        w_blocks.append(jnp.concatenate([wl, wr], axis=1))          # (din_p, 256)
        w_offsets.append(row)
        row += din_p
        d_ins.append(din_p)
        d_valids.append(dout_v)
    w_slab = jnp.concatenate(w_blocks, axis=0).astype(jnp.bfloat16)  # (512, 256)

    # --- pack bias / gamma / beta (3 per layer) into one (9, 128) f32 slab ---
    p_rows = []
    for pm in params:
        for name in ("b", "gamma", "beta"):
            v = pm[name].reshape(1, -1).astype(jnp.float32)
            p_rows.append(jnp.zeros((1, LANE), jnp.float32).at[:, :v.shape[1]].set(v))
    p_slab = jnp.concatenate(p_rows, axis=0)                         # (9, 128)

    ins = [A_cnt.astype(jnp.bfloat16),               # (N, N)   bf16 counts
           inv_deg.astype(jnp.float32),              # (N, 1)   f32
           x.astype(jnp.bfloat16),                   # (N, 256) bf16
           w_slab,                                   # (512, 256) bf16
           p_slab]                                   # (9, 128) f32

    def full(shape):
        return pl.BlockSpec(shape, lambda i, _n=len(shape): (0,) * _n)

    # Explicit VMEM budget: all inputs + output resident, x2 for pipeline
    # buffers, plus headroom.  Clamped so it stays valid on v5e/v6e/v7x.
    in_bytes = sum(int(a.size) * a.dtype.itemsize for a in ins)
    out_bytes = N * LANE * 4
    vmem_limit = int(min(max(2 * (in_bytes + out_bytes) + (4 << 20), 16 << 20), 48 << 20))

    out = pl.pallas_call(
        functools.partial(_mbgcn_fused_kernel,
                          d_valids=tuple(d_valids),
                          w_offsets=tuple(w_offsets),
                          d_ins=tuple(d_ins)),
        out_shape=jax.ShapeDtypeStruct((N, LANE), jnp.float32),
        grid=(1,),
        in_specs=[full(a.shape) for a in ins],
        out_specs=full((N, LANE)),
        compiler_params=pltpu.CompilerParams(
            dimension_semantics=("arbitrary",),
            vmem_limit_bytes=vmem_limit),
    )(*ins)

    return out[:, :d_out_final]


def build_adjacency(edge_index, num_nodes):
    """Exact bf16 edge-count adjacency + f32 inverse in-degree column.

    A_cnt[i, j] = number of edges j -> i (exact in bf16 for counts <= 256);
    mean aggregation is applied inside the kernel as (A_cnt @ x) * inv_deg
    with the 1/deg scale kept in f32.
    """
    src = edge_index[0]
    dst = edge_index[1]
    counts = jnp.zeros((num_nodes, num_nodes), jnp.bfloat16).at[dst, src].add(1.0)
    deg = jnp.sum(counts, axis=1, keepdims=True, dtype=jnp.float32)
    inv_deg = jnp.where(deg > 0, 1.0 / jnp.maximum(deg, 1.0), 0.0)
    return counts, inv_deg


def init_mbgcn_params(key):
    """Deterministic synthetic parameters matching MBGCN's layer shapes."""
    dims = [(256, 128), (128, 64), (64, 64)]
    params = []
    for li, (din, dout) in enumerate(dims):
        k = jax.random.fold_in(key, li)
        k_wl, k_wr = jax.random.split(k)
        scale = 1.0 / jnp.sqrt(jnp.float32(din))
        params.append(dict(
            Wl=jax.random.normal(k_wl, (din, dout), jnp.float32) * scale,
            Wr=jax.random.normal(k_wr, (din, dout), jnp.float32) * scale,
            b=jnp.zeros((1, dout), jnp.float32),
            gamma=jnp.ones((1, dout), jnp.float32),
            beta=jnp.zeros((1, dout), jnp.float32),
        ))
    return params


@jax.jit
def mbgcn_forward(x, edge_index, params):
    """MBGCN.forward: gcn1->relu1->gcn2->relu2->gcn3->relu3 (fused)."""
    A_cnt, inv_deg = build_adjacency(edge_index, x.shape[0])
    return mbgcn_fused_forward(A_cnt, inv_deg, x, params)


def mbgcn_reference(x, edge_index, params):
    """Pure-JAX f32 reference of the same forward pass (for a sanity check)."""
    N = x.shape[0]
    src, dst = edge_index[0], edge_index[1]
    adj = jnp.zeros((N, N), jnp.float32).at[dst, src].add(1.0)
    deg = jnp.sum(adj, axis=1, keepdims=True)
    A = jnp.where(deg > 0, adj / jnp.maximum(deg, 1.0), 0.0)
    h = x
    for p in params:
        z = (A @ h) @ p["Wl"] + h @ p["Wr"] + p["b"]
        z = jnp.maximum(z, 0.0)
        mean = jnp.mean(z, axis=-1, keepdims=True)
        c = z - mean
        var = jnp.mean(c * c, axis=-1, keepdims=True)
        h = c * jax.lax.rsqrt(var + LN_EPS) * p["gamma"] + p["beta"]
    return h


if __name__ == "__main__":
    key = jax.random.PRNGKey(0)
    k_x, k_e, k_p = jax.random.split(key, 3)

    N = 32           # number of graph nodes
    IN_FEATS = 256   # gcn1 expects 256-d input features
    E = 96           # number of directed edges

    x = jax.random.normal(k_x, (N, IN_FEATS), jnp.float32)
    edge_index = jax.random.randint(k_e, (2, E), 0, N, dtype=jnp.int32)
    params = init_mbgcn_params(k_p)

    out = mbgcn_forward(x, edge_index, params)
    out = jax.block_until_ready(out)

    assert out.shape == (N, 64), out.shape
    assert bool(jnp.all(jnp.isfinite(out)))

    # bf16 MXU inputs with f32 accumulation and exact counts + f32 inv-degree:
    # tolerance vs. the pure-f32 reference (post-LayerNorm, O(1) outputs).
    ref = mbgcn_reference(x, edge_index, params)
    max_err = float(jnp.max(jnp.abs(out - ref)))
    assert max_err < 0.2, f"max abs error vs f32 reference: {max_err}"

    print("KERNEL_OK")
</pallas_src>

<mosaic_0001>
module attributes {stable_mosaic.version = 11 : i64} {
  func.func @_mbgcn_fused_kernel(%arg0: i32, %arg1: memref<32x32xbf16, #tpu.memory_space<vmem>>, %arg2: memref<32x1xf32, #tpu.memory_space<vmem>>, %arg3: memref<32x256xbf16, #tpu.memory_space<vmem>>, %arg4: memref<512x256xbf16, #tpu.memory_space<vmem>>, %arg5: memref<9x128xf32, #tpu.memory_space<vmem>>, %arg6: memref<32x128xf32, #tpu.memory_space<vmem>>) attributes {dimension_semantics = [#tpu.dimension_semantics<arbitrary>], iteration_bounds = array<i64: 1>, scalar_prefetch = 0 : i64, scratch_operands = 0 : i64, tpu.core_type = #tpu.core_type<tc>, window_params = [{pipeline_mode = #tpu.pipeline_mode<synchronous>, transform_indices = @transform_0, window_bounds = array<i64: 32, 32>}, {pipeline_mode = #tpu.pipeline_mode<synchronous>, transform_indices = @transform_1, window_bounds = array<i64: 32, 1>}, {pipeline_mode = #tpu.pipeline_mode<synchronous>, transform_indices = @transform_2, window_bounds = array<i64: 32, 256>}, {pipeline_mode = #tpu.pipeline_mode<synchronous>, transform_indices = @transform_3, window_bounds = array<i64: 512, 256>}, {pipeline_mode = #tpu.pipeline_mode<synchronous>, transform_indices = @transform_4, window_bounds = array<i64: 9, 128>}, {pipeline_mode = #tpu.pipeline_mode<synchronous>, transform_indices = @transform_5, window_bounds = array<i64: 32, 128>}]} {
    %c0 = arith.constant 0 : index
    %c0_0 = arith.constant 0 : index
    %0 = vector.load %arg1[%c0, %c0_0] : memref<32x32xbf16, #tpu.memory_space<vmem>>, vector<32x32xbf16>
    %c0_1 = arith.constant 0 : index
    %c0_2 = arith.constant 0 : index
    %1 = vector.load %arg2[%c0_1, %c0_2] : memref<32x1xf32, #tpu.memory_space<vmem>>, vector<32x1xf32>
    %c0_3 = arith.constant 0 : index
    %c0_4 = arith.constant 0 : index
    %2 = vector.load %arg5[%c0_3, %c0_4] : memref<9x128xf32, #tpu.memory_space<vmem>>, vector<9x128xf32>
    %c0_5 = arith.constant 0 : index
    %c0_6 = arith.constant 0 : index
    %3 = vector.load %arg3[%c0_5, %c0_6] : memref<32x256xbf16, #tpu.memory_space<vmem>>, vector<32x256xbf16>
    %c0_7 = arith.constant 0 : index
    %c0_8 = arith.constant 0 : index
    %4 = vector.load %arg4[%c0_7, %c0_8] : memref<512x256xbf16, #tpu.memory_space<vmem>>, vector<256x256xbf16>
    %5 = vector.extract_strided_slice %2 {offsets = [0, 0], sizes = [1, 128], strides = [1, 1]} : vector<9x128xf32> to vector<1x128xf32>
    %6 = vector.extract_strided_slice %2 {offsets = [1, 0], sizes = [1, 128], strides = [1, 1]} : vector<9x128xf32> to vector<1x128xf32>
    %7 = vector.extract_strided_slice %2 {offsets = [2, 0], sizes = [1, 128], strides = [1, 1]} : vector<9x128xf32> to vector<1x128xf32>
    %cst = arith.constant dense<0.000000e+00> : vector<32x256xf32>
    %8 = tpu.matmul %3, %4, %cst {dimension_numbers = #tpu.dot_dimension_numbers<[1], [0], [0], [1], [0, 0, 1, 1], [], []>} : vector<32x256xbf16>, vector<256x256xbf16>, vector<32x256xf32> -> vector<32x256xf32>
    %9 = vector.extract_strided_slice %8 {offsets = [0, 0], sizes = [32, 128], strides = [1, 1]} : vector<32x256xf32> to vector<32x128xf32>
    %10 = vector.extract_strided_slice %8 {offsets = [0, 128], sizes = [32, 128], strides = [1, 1]} : vector<32x256xf32> to vector<32x128xf32>
    %11 = arith.truncf %9 : vector<32x128xf32> to vector<32x128xbf16>
    %cst_9 = arith.constant dense<0.000000e+00> : vector<32x128xf32>
    %12 = tpu.matmul %0, %11, %cst_9 {dimension_numbers = #tpu.dot_dimension_numbers<[1], [0], [0], [1], [0, 0, 1, 1], [], []>} : vector<32x32xbf16>, vector<32x128xbf16>, vector<32x128xf32> -> vector<32x128xf32>
    %13 = vector.broadcast %1 : vector<32x1xf32> to vector<32x128xf32>
    %14 = arith.mulf %12, %13 : vector<32x128xf32>
    %15 = arith.addf %14, %10 : vector<32x128xf32>
    %16 = vector.broadcast %5 : vector<1x128xf32> to vector<32x128xf32>
    %17 = arith.addf %15, %16 : vector<32x128xf32>
    %cst_10 = arith.constant 0.000000e+00 : f32
    %18 = vector.broadcast %cst_10 : f32 to vector<32x128xf32>
    %19 = arith.maximumf %17, %18 : vector<32x128xf32>
    %cst_11 = arith.constant dense<0.000000e+00> : vector<32xf32>
    %20 = vector.multi_reduction <add>, %19, %cst_11 [1] : vector<32x128xf32> to vector<32xf32>
    %21 = vector.shape_cast %20 : vector<32xf32> to vector<32x1xf32>
    %cst_12 = arith.constant 7.812500e-03 : f32
    %22 = vector.broadcast %cst_12 : f32 to vector<32x1xf32>
    %23 = arith.mulf %21, %22 : vector<32x1xf32>
    %24 = vector.broadcast %23 : vector<32x1xf32> to vector<32x128xf32>
    %25 = arith.subf %19, %24 : vector<32x128xf32>
    %26 = arith.mulf %25, %25 : vector<32x128xf32>
    %cst_13 = arith.constant dense<0.000000e+00> : vector<32xf32>
    %27 = vector.multi_reduction <add>, %26, %cst_13 [1] : vector<32x128xf32> to vector<32xf32>
    %28 = vector.shape_cast %27 : vector<32xf32> to vector<32x1xf32>
    %cst_14 = arith.constant 7.812500e-03 : f32
    %29 = vector.broadcast %cst_14 : f32 to vector<32x1xf32>
    %30 = arith.mulf %28, %29 : vector<32x1xf32>
    %cst_15 = arith.constant 9.99999974E-6 : f32
    %31 = vector.broadcast %cst_15 : f32 to vector<32x1xf32>
    %32 = arith.addf %30, %31 : vector<32x1xf32>
    %33 = math.rsqrt %32 : vector<32x1xf32>
    %34 = vector.broadcast %33 : vector<32x1xf32> to vector<32x128xf32>
    %35 = arith.mulf %25, %34 : vector<32x128xf32>
    %36 = vector.broadcast %6 : vector<1x128xf32> to vector<32x128xf32>
    %37 = arith.mulf %35, %36 : vector<32x128xf32>
    %38 = vector.broadcast %7 : vector<1x128xf32> to vector<32x128xf32>
    %39 = arith.addf %37, %38 : vector<32x128xf32>
    %40 = arith.truncf %39 : vector<32x128xf32> to vector<32x128xbf16>
    %c256 = arith.constant 256 : index
    %c0_16 = arith.constant 0 : index
    %41 = vector.load %arg4[%c256, %c0_16] : memref<512x256xbf16, #tpu.memory_space<vmem>>, vector<128x256xbf16>
    %42 = vector.extract_strided_slice %2 {offsets = [3, 0], sizes = [1, 128], strides = [1, 1]} : vector<9x128xf32> to vector<1x128xf32>
    %43 = vector.extract_strided_slice %2 {offsets = [4, 0], sizes = [1, 128], strides = [1, 1]} : vector<9x128xf32> to vector<1x128xf32>
    %44 = vector.extract_strided_slice %2 {offsets = [5, 0], sizes = [1, 128], strides = [1, 1]} : vector<9x128xf32> to vector<1x128xf32>
    %cst_17 = arith.constant dense<0.000000e+00> : vector<32x256xf32>
    %45 = tpu.matmul %40, %41, %cst_17 {dimension_numbers = #tpu.dot_dimension_numbers<[1], [0], [0], [1], [0, 0, 1, 1], [], []>} : vector<32x128xbf16>, vector<128x256xbf16>, vector<32x256xf32> -> vector<32x256xf32>
    %46 = vector.extract_strided_slice %45 {offsets = [0, 0], sizes = [32, 128], strides = [1, 1]} : vector<32x256xf32> to vector<32x128xf32>
    %47 = vector.extract_strided_slice %45 {offsets = [0, 128], sizes = [32, 128], strides = [1, 1]} : vector<32x256xf32> to vector<32x128xf32>
    %48 = arith.truncf %46 : vector<32x128xf32> to vector<32x128xbf16>
    %cst_18 = arith.constant dense<0.000000e+00> : vector<32x128xf32>
    %49 = tpu.matmul %0, %48, %cst_18 {dimension_numbers = #tpu.dot_dimension_numbers<[1], [0], [0], [1], [0, 0, 1, 1], [], []>} : vector<32x32xbf16>, vector<32x128xbf16>, vector<32x128xf32> -> vector<32x128xf32>
    %50 = vector.broadcast %1 : vector<32x1xf32> to vector<32x128xf32>
    %51 = arith.mulf %49, %50 : vector<32x128xf32>
    %52 = arith.addf %51, %47 : vector<32x128xf32>
    %53 = vector.broadcast %42 : vector<1x128xf32> to vector<32x128xf32>
    %54 = arith.addf %52, %53 : vector<32x128xf32>
    %cst_19 = arith.constant 0.000000e+00 : f32
    %55 = vector.broadcast %cst_19 : f32 to vector<32x128xf32>
    %56 = arith.maximumf %54, %55 : vector<32x128xf32>
    %cst_20 = arith.constant dense<0.000000e+00> : vector<32xf32>
    %57 = vector.multi_reduction <add>, %56, %cst_20 [1] : vector<32x128xf32> to vector<32xf32>
    %58 = vector.shape_cast %57 : vector<32xf32> to vector<32x1xf32>
    %cst_21 = arith.constant 1.562500e-02 : f32
    %59 = vector.broadcast %cst_21 : f32 to vector<32x1xf32>
    %60 = arith.mulf %58, %59 : vector<32x1xf32>
    %61 = vector.broadcast %60 : vector<32x1xf32> to vector<32x128xf32>
    %62 = arith.subf %56, %61 : vector<32x128xf32>
    %63 = arith.mulf %62, %62 : vector<32x128xf32>
    %cst_22 = arith.constant dense<0.000000e+00> : vector<32xf32>
    %64 = vector.multi_reduction <add>, %63, %cst_22 [1] : vector<32x128xf32> to vector<32xf32>
    %65 = vector.shape_cast %64 : vector<32xf32> to vector<32x1xf32>
    %cst_23 = arith.constant 1.562500e-02 : f32
    %66 = vector.broadcast %cst_23 : f32 to vector<32x1xf32>
    %67 = arith.mulf %65, %66 : vector<32x1xf32>
    %68 = arith.mulf %60, %60 : vector<32x1xf32>
    %cst_24 = arith.constant 1.000000e+00 : f32
    %69 = vector.broadcast %cst_24 : f32 to vector<32x1xf32>
    %70 = arith.mulf %69, %68 : vector<32x1xf32>
    %71 = arith.subf %67, %70 : vector<32x1xf32>
    %cst_25 = arith.constant 9.99999974E-6 : f32
    %72 = vector.broadcast %cst_25 : f32 to vector<32x1xf32>
    %73 = arith.addf %71, %72 : vector<32x1xf32>
    %74 = math.rsqrt %73 : vector<32x1xf32>
    %75 = vector.broadcast %74 : vector<32x1xf32> to vector<32x128xf32>
    %76 = arith.mulf %62, %75 : vector<32x128xf32>
    %77 = vector.broadcast %43 : vector<1x128xf32> to vector<32x128xf32>
    %78 = arith.mulf %76, %77 : vector<32x128xf32>
    %79 = vector.broadcast %44 : vector<1x128xf32> to vector<32x128xf32>
    %80 = arith.addf %78, %79 : vector<32x128xf32>
    %81 = arith.truncf %80 : vector<32x128xf32> to vector<32x128xbf16>
    %c384 = arith.constant 384 : index
    %c0_26 = arith.constant 0 : index
    %82 = vector.load %arg4[%c384, %c0_26] : memref<512x256xbf16, #tpu.memory_space<vmem>>, vector<128x256xbf16>
    %83 = vector.extract_strided_slice %2 {offsets = [6, 0], sizes = [1, 128], strides = [1, 1]} : vector<9x128xf32> to vector<1x128xf32>
    %84 = vector.extract_strided_slice %2 {offsets = [7, 0], sizes = [1, 128], strides = [1, 1]} : vector<9x128xf32> to vector<1x128xf32>
    %85 = vector.extract_strided_slice %2 {offsets = [8, 0], sizes = [1, 128], strides = [1, 1]} : vector<9x128xf32> to vector<1x128xf32>
    %cst_27 = arith.constant dense<0.000000e+00> : vector<32x256xf32>
    %86 = tpu.matmul %81, %82, %cst_27 {dimension_numbers = #tpu.dot_dimension_numbers<[1], [0], [0], [1], [0, 0, 1, 1], [], []>} : vector<32x128xbf16>, vector<128x256xbf16>, vector<32x256xf32> -> vector<32x256xf32>
    %87 = vector.extract_strided_slice %86 {offsets = [0, 0], sizes = [32, 128], strides = [1, 1]} : vector<32x256xf32> to vector<32x128xf32>
    %88 = vector.extract_strided_slice %86 {offsets = [0, 128], sizes = [32, 128], strides = [1, 1]} : vector<32x256xf32> to vector<32x128xf32>
    %89 = arith.truncf %87 : vector<32x128xf32> to vector<32x128xbf16>
    %cst_28 = arith.constant dense<0.000000e+00> : vector<32x128xf32>
    %90 = tpu.matmul %0, %89, %cst_28 {dimension_numbers = #tpu.dot_dimension_numbers<[1], [0], [0], [1], [0, 0, 1, 1], [], []>} : vector<32x32xbf16>, vector<32x128xbf16>, vector<32x128xf32> -> vector<32x128xf32>
    %91 = vector.broadcast %1 : vector<32x1xf32> to vector<32x128xf32>
    %92 = arith.mulf %90, %91 : vector<32x128xf32>
    %93 = arith.addf %92, %88 : vector<32x128xf32>
    %94 = vector.broadcast %83 : vector<1x128xf32> to vector<32x128xf32>
    %95 = arith.addf %93, %94 : vector<32x128xf32>
    %cst_29 = arith.constant 0.000000e+00 : f32
    %96 = vector.broadcast %cst_29 : f32 to vector<32x128xf32>
    %97 = arith.maximumf %95, %96 : vector<32x128xf32>
    %cst_30 = arith.constant dense<0.000000e+00> : vector<32xf32>
    %98 = vector.multi_reduction <add>, %97, %cst_30 [1] : vector<32x128xf32> to vector<32xf32>
    %99 = vector.shape_cast %98 : vector<32xf32> to vector<32x1xf32>
    %cst_31 = arith.constant 1.562500e-02 : f32
    %100 = vector.broadcast %cst_31 : f32 to vector<32x1xf32>
    %101 = arith.mulf %99, %100 : vector<32x1xf32>
    %102 = vector.broadcast %101 : vector<32x1xf32> to vector<32x128xf32>
    %103 = arith.subf %97, %102 : vector<32x128xf32>
    %104 = arith.mulf %103, %103 : vector<32x128xf32>
    %cst_32 = arith.constant dense<0.000000e+00> : vector<32xf32>
    %105 = vector.multi_reduction <add>, %104, %cst_32 [1] : vector<32x128xf32> to vector<32xf32>
    %106 = vector.shape_cast %105 : vector<32xf32> to vector<32x1xf32>
    %cst_33 = arith.constant 1.562500e-02 : f32
    %107 = vector.broadcast %cst_33 : f32 to vector<32x1xf32>
    %108 = arith.mulf %106, %107 : vector<32x1xf32>
    %109 = arith.mulf %101, %101 : vector<32x1xf32>
    %cst_34 = arith.constant 1.000000e+00 : f32
    %110 = vector.broadcast %cst_34 : f32 to vector<32x1xf32>
    %111 = arith.mulf %110, %109 : vector<32x1xf32>
    %112 = arith.subf %108, %111 : vector<32x1xf32>
    %cst_35 = arith.constant 9.99999974E-6 : f32
    %113 = vector.broadcast %cst_35 : f32 to vector<32x1xf32>
    %114 = arith.addf %112, %113 : vector<32x1xf32>
    %115 = math.rsqrt %114 : vector<32x1xf32>
    %116 = vector.broadcast %115 : vector<32x1xf32> to vector<32x128xf32>
    %117 = arith.mulf %103, %116 : vector<32x128xf32>
    %118 = vector.broadcast %84 : vector<1x128xf32> to vector<32x128xf32>
    %119 = arith.mulf %117, %118 : vector<32x128xf32>
    %120 = vector.broadcast %85 : vector<1x128xf32> to vector<32x128xf32>
    %121 = arith.addf %119, %120 : vector<32x128xf32>
    %c0_36 = arith.constant 0 : index
    %c0_37 = arith.constant 0 : index
    %122 = vector.load %arg6[%c0_36, %c0_37] : memref<32x128xf32, #tpu.memory_space<vmem>>, vector<32x128xf32>
    tpu.vector_store %arg6[%c0_36, %c0_37], %121 {strides = array<i32>} : memref<32x128xf32, #tpu.memory_space<vmem>>, vector<32x128xf32>,
    return
  }
  func.func @transform_0(%arg0: i32) -> (i32, i32) {
    %c0_i32 = arith.constant 0 : i32
    %c0_i32_0 = arith.constant 0 : i32
    %c0_i32_1 = arith.constant 0 : i32
    return %c0_i32, %c0_i32_0 : i32, i32
  }
  func.func @transform_1(%arg0: i32) -> (i32, i32) {
    %c0_i32 = arith.constant 0 : i32
    %c0_i32_0 = arith.constant 0 : i32
    %c0_i32_1 = arith.constant 0 : i32
    return %c0_i32, %c0_i32_0 : i32, i32
  }
  func.func @transform_2(%arg0: i32) -> (i32, i32) {
    %c0_i32 = arith.constant 0 : i32
    %c0_i32_0 = arith.constant 0 : i32
    %c0_i32_1 = arith.constant 0 : i32
    return %c0_i32, %c0_i32_0 : i32, i32
  }
  func.func @transform_3(%arg0: i32) -> (i32, i32) {
    %c0_i32 = arith.constant 0 : i32
    %c0_i32_0 = arith.constant 0 : i32
    %c0_i32_1 = arith.constant 0 : i32
    return %c0_i32, %c0_i32_0 : i32, i32
  }
  func.func @transform_4(%arg0: i32) -> (i32, i32) {
    %c0_i32 = arith.constant 0 : i32
    %c0_i32_0 = arith.constant 0 : i32
    %c0_i32_1 = arith.constant 0 : i32
    return %c0_i32, %c0_i32_0 : i32, i32
  }
  func.func @transform_5(%arg0: i32) -> (i32, i32) {
    %c0_i32 = arith.constant 0 : i32
    %c0_i32_0 = arith.constant 0 : i32
    %c0_i32_1 = arith.constant 0 : i32
    return %c0_i32, %c0_i32_0 : i32, i32
  }
}

</mosaic_0001>

<bundles_post_ra>
// kernel: mbgcn_forward.1
= control target key start
LH: loop header
LB: loop body
LE: loop exit
PB: predicated region body
PF: predicated region fallthrough
CT: control target
= control target key end

     0   :  { %s1700_s0 = inlined_call_operand.vmem [shape: bf16[32,32], index: 0, kind: input, shape index: {}]   ;;  %s1701_s1 = inlined_call_operand.vmem [shape: f32[32,1], index: 1, kind: input, shape index: {}]   ;;  %s1702_s2 = inlined_call_operand.vmem [shape: bf16[32,256], index: 2, kind: input, shape index: {}]   ;;  %s1703_s3 = inlined_call_operand.vmem [shape: bf16[512,256], index: 3, kind: input, shape index: {}]   ;;  %s1704_s4 = inlined_call_operand.vmem [shape: f32[9,128], index: 4, kind: input, shape index: {}]   ;;  %s1705_s5 = inlined_call_operand.hbm [shape: f32[32,128], index: 5, kind: output, shape index: {}]  }
   0x1   :  { %v1188_v0 = vld [vmem:[%s1703_s3 + $0x74] ss:$8 sps:$4 sm:$0xff]   ;;  %v1190_v1 = vld [vmem:[%s1703_s3 + $0x70] ss:$8 sps:$4 sm:$0xff]   ;;  %v1191_v2 = vld [vmem:[%s1703_s3 + $0x64] ss:$8 sps:$4 sm:$0xff]  }
   0x2   :  { %248 = vmatprep.subr.bf16.mxu0 %v1188_v0  ;;  %v1193_v3 = vld [vmem:[%s1703_s3 + $0x60] ss:$8 sps:$4 sm:$0xff]   ;;  %v1194_v4 = vld [vmem:[%s1703_s3 + $0x54] ss:$8 sps:$4 sm:$0xff]   ;;  %v1196_v5 = vld [vmem:[%s1703_s3 + $0x50] ss:$8 sps:$4 sm:$0xff]  }
   0x3   :  { %249 = vmatpush1.bf16.msra.mxu0 %v1190_v1  ;;  %v1197_v6 = vld [vmem:[%s1703_s3 + $0x44] ss:$8 sps:$4 sm:$0xff]   ;;  %v1199_v7 = vld [vmem:[%s1703_s3 + $0x40] ss:$8 sps:$4 sm:$0xff]   ;;  %v1200_v8 = vld [vmem:[%s1703_s3 + $0x34] ss:$8 sps:$4 sm:$0xff]  }
   0x4   :  { %250 = vmatprep.subr.bf16.mxu0 %v1191_v2  ;;  %v1202_v9 = vld [vmem:[%s1703_s3 + $0x30] ss:$8 sps:$4 sm:$0xff]   ;;  %v1203_v10 = vld [vmem:[%s1703_s3 + $0x24] ss:$8 sps:$4 sm:$0xff]   ;;  %v1205_v11 = vld [vmem:[%s1703_s3 + $0x20] ss:$8 sps:$4 sm:$0xff]  }
   0x5   :  { %v1206_v12 = vld [vmem:[%s1703_s3 + $0x14] ss:$8 sps:$4 sm:$0xff]   ;;  %v1238_v13 = vld [vmem:[%s1702_s2 + $0x4] ss:$8 sps:$4 sm:$0xff]   ;;  %v1208_v14 = vld [vmem:[%s1703_s3 + $0x10] ss:$8 sps:$4 sm:$0xff]  }
   0x6   :  { %v1209_v15 = vld [vmem:[%s1703_s3 + $0x4] ss:$8 sps:$4 sm:$0xff]   ;;  %280 = vmatprep.mubr.bf16.mxu0 %v1238_v13  ;;  %v1211_v16 = vld [vmem:[%s1703_s3] ss:$8 sps:$4 sm:$0xff]   ;;  %v1212_v17 = vld [vmem:[%s1703_s3 + $0xf4] ss:$8 sps:$4 sm:$0xff]  }
   0x7   :  { %251 = vmatpush1.bf16.msra.mxu0 %v1193_v3  ;;  %v1214_v18 = vld [vmem:[%s1703_s3 + $0xf0] ss:$8 sps:$4 sm:$0xff]   ;;  %v1215_v19 = vld [vmem:[%s1703_s3 + $0xe4] ss:$8 sps:$4 sm:$0xff]   ;;  %v1217_v20 = vld [vmem:[%s1703_s3 + $0xe0] ss:$8 sps:$4 sm:$0xff]  }
   0x8   :  { %252 = vmatprep.subr.bf16.mxu0 %v1194_v4  ;;  %v1218_v21 = vld [vmem:[%s1703_s3 + $0xd4] ss:$8 sps:$4 sm:$0xff]  }
   0xb   :  { %253 = vmatpush1.bf16.msra.mxu0 %v1196_v5 }
   0xc   :  { %254 = vmatprep.subr.bf16.mxu0 %v1197_v6 }
   0xf   :  { %255 = vmatpush1.bf16.msra.mxu0 %v1199_v7 }
  0x10   :  { %256 = vmatprep.subr.bf16.mxu0 %v1200_v8 }
  0x13   :  { %257 = vmatpush1.bf16.msra.mxu0 %v1202_v9 }
  0x14   :  { %258 = vmatprep.subr.bf16.mxu0 %v1203_v10 }
  0x17   :  { %259 = vmatpush1.bf16.msra.mxu0 %v1205_v11 }
  0x18   :  { %260 = vmatprep.subr.bf16.mxu0 %v1206_v12 }
  0x1b   :  { %261 = vmatpush1.bf16.msra.mxu0 %v1208_v14 }
  0x1c   :  { %262 = vmatprep.subr.bf16.mxu0 %v1209_v15 }
  0x1f   :  { %263 = vmatpush1.bf16.msra.mxu0 %v1211_v16 }
  0x20   :  { %264 = vmatprep.subr.bf16.mxu0 %v1212_v17 }
  0x23   :  { %265 = vmatpush2.bf16.msra.mxu0 %v1214_v18 }
  0x24   :  { %266 = vmatprep.subr.bf16.mxu0 %v1215_v19 }
  0x25   :  { %10 = vsyncpa [#allocation3], 0  ;;  %v1220_v22 = vld [vmem:[%s1703_s3 + $0xd0] ss:$8 sps:$4 sm:$0xff]   ;;  %v1221_v23 = vld [vmem:[%s1703_s3 + $0xc4] ss:$8 sps:$4 sm:$0xff]   ;;  %v397_v52 = vlaneseq }
  0x26   :  { %v1223_v24 = vld [vmem:[%s1703_s3 + $0xc0] ss:$8 sps:$4 sm:$0xff]   ;;  %v1224_v25 = vld [vmem:[%s1703_s3 + $0xb4] ss:$8 sps:$4 sm:$0xff]   ;;  %v1226_v26 = vld [vmem:[%s1703_s3 + $0xb0] ss:$8 sps:$4 sm:$0xff]  }
  0x27   :  { %267 = vmatpush2.bf16.msra.mxu0 %v1217_v20  ;;  %v1227_v27 = vld [vmem:[%s1703_s3 + $0xa4] ss:$8 sps:$4 sm:$0xff]   ;;  %v1229_v28 = vld [vmem:[%s1703_s3 + $0xa0] ss:$8 sps:$4 sm:$0xff]   ;;  %v1230_v29 = vld [vmem:[%s1703_s3 + $0x94] ss:$8 sps:$4 sm:$0xff]  }
  0x28   :  { %268 = vmatprep.subr.bf16.mxu0 %v1218_v21  ;;  %v1232_v30 = vld [vmem:[%s1703_s3 + $0x90] ss:$8 sps:$4 sm:$0xff]   ;;  %v1233_v31 = vld [vmem:[%s1703_s3 + $0x84] ss:$8 sps:$4 sm:$0xff]   ;;  %v1235_v32 = vld [vmem:[%s1703_s3 + $0x80] ss:$8 sps:$4 sm:$0xff]  }
  0x29   :  { %v1236_v33 = vld [vmem:[%s1702_s2] ss:$8 sps:$4 sm:$0xff]   ;;  %v1239_v34 = vld [vmem:[%s1702_s2 + $0x14] ss:$8 sps:$4 sm:$0xff]   ;;  %v1241_v35 = vld [vmem:[%s1702_s2 + $0x10] ss:$8 sps:$4 sm:$0xff]  }
  0x2a   :  { %v1483_v36 = vld [vmem:[%s1700_s0] sm:$0xff]   ;;  %vm313_vm0 = vcmask 261120   ;;  %v28_v38 = vld [vmem:[%s1701_s1 + $0x10] sm:$0xff]  ;;  %v1338_v39 = vmov 0   ;;  %v27_v40 = vld [vmem:[%s1701_s1 + $0x8] sm:$0xff]  ;;  %v1513_v54 = vshrl.u32 %v397_v52, 7 }
  0x2b   :  { %269 = vmatpush2.bf16.msra.mxu0 %v1220_v22  ;;  %v26_v37 = vld [vmem:[%s1701_s1] sm:$0xff]  ;;  %1186 = vset.pattern.permute.xlu0 %v1338_v39  ;;  %v29_v41 = vld [vmem:[%s1701_s1 + $0x18] sm:$0xff]  ;;  %v1505_v51 = vld [vmem:[%s1700_s0 + $0x8] sm:$0xff]   ;;  %s1339_s10 = smov [#allocation2]  }
  0x2c   :  { %270 = vmatprep.subr.bf16.mxu0 %v1221_v23  ;;  %1187 = vset.pattern.permute.xlu1 %v1338_v39  ;;  %v399_v59 = vsub.s32 0, %v1513_v54  ;;  %v1524_v62 = vld [vmem:[%s1704_s4] sm:$0xff]  ;;  %v1244_v18 = vld [vmem:[%s1703_s3 + $0x174] ss:$8 sps:$4 sm:$0xff]   ;;  %v1246_v19 = vld [vmem:[%s1703_s3 + $0x170] ss:$8 sps:$4 sm:$0xff]  }
  0x2d   :  { %371 = vperm.xlu0 %1186, %v26_v37   ;;  %381 = vperm.xlu1 %1187, %v28_v38   ;;  %v1247_v37 = vld [vmem:[%s1703_s3 + $0x164] ss:$8 sps:$4 sm:$0xff]   ;;  %v1249_v38 = vld [vmem:[%s1703_s3 + $0x160] ss:$8 sps:$4 sm:$0xff]   ;;  %s1058_s11 = sshll.u32 %s1339_s10, 4  ;;  %s1059_s11 = int_to_ptr.vmem [resolvable:$true] %s1058_s11 }
  0x2e   :  { %599 = vmatprep.mubr.bf16.mxu1 %v1338_v39  ;;  %v400_v4 = vrot.slane %v1524_v62, %v399_v59  ;;  %567 = vmatprep.subr.bf16.mxu1 %v1244_v18  ;;  %v1267_v52 = vld [vmem:[%s1703_s3 + $0x100] ss:$8 sps:$4 sm:$0xff]   ;;  %p1321_p1 = scmp.lt.s32.totalorder %s1059_s11, %s1059_s11 }
  0x2f   :  { %271 = vmatpush2.bf16.msra.mxu0 %v1223_v24  ;;  %568 = vmatpush1.bf16.msra.mxu1 %v1246_v19 }
  0x30   :  { %272 = vmatprep.subr.bf16.mxu0 %v1224_v25  ;;  %569 = vmatprep.subr.bf16.mxu1 %v1247_v37 }
  0x31   :  { %376 = vperm.xlu0 %1186, %v27_v40   ;;  %386 = vperm.xlu1 %1187, %v29_v41   ;;  %v1250_v40 = vld [vmem:[%s1703_s3 + $0x154] ss:$8 sps:$4 sm:$0xff]   ;;  %v1252_v41 = vld [vmem:[%s1703_s3 + $0x150] ss:$8 sps:$4 sm:$0xff]  }
  0x33   :  { %273 = vmatpush2.bf16.msra.mxu0 %v1226_v26  ;;  %570 = vmatpush1.bf16.msra.mxu1 %v1249_v38 }
  0x34   :  { %274 = vmatprep.subr.bf16.mxu0 %v1227_v27  ;;  %571 = vmatprep.subr.bf16.mxu1 %v1250_v40 }
  0x37   :  { %275 = vmatpush2.bf16.msra.mxu0 %v1229_v28  ;;  %572 = vmatpush1.bf16.msra.mxu1 %v1252_v41 }
  0x38   :  { %276 = vmatprep.subr.bf16.mxu0 %v1230_v29 }
  0x3b   :  { %277 = vmatpush2.bf16.msra.mxu0 %v1232_v30 }
  0x3c   :  { %278 = vmatprep.subr.bf16.mxu0 %v1233_v31 }
  0x3f   :  { %279 = vmatpush2.bf16.msra.mxu0 %v1235_v32 }
  0x42   :  { %281 = vmatmul.mubr.bf16.vlgmr.msra.gmra.mxu0 %v1236_v33 }
  0x43   :  { %290 = vmatprep.mubr.bf16.mxu0 %v1239_v34 }
  0x4a   :  { %291 = vmatmul.mubr.bf16.gmra.mxu0 %v1241_v35 }
  0x4b   :  { %1162 = vmatprep.mubr.msk.bf16.mxu0 %vm313_vm0, %v1483_v36 }
  0xa8   :  { %v1511_v53 = vpop.permute.xlu1 %381  ;;  %v1515_v56 = vpop.permute.xlu0 %371 }
  0xac   :  { %v1519_v61 = vpop.permute.xlu1 %386  ;;  %v1529_v5 = vpop.permute.xlu0 %376 }
 0x102   :  { %v282_v42 = vpop.f32.mrf.mxu0 }
 0x104   :  { %v284_v43 = vpop.f32.mrf.mxu0 }
 0x106   :  { %v286_v44 = vpop.f32.mrf.mxu0 }
 0x107   :  { %v301_v50 = vpack.c.bf16 %v286_v44, %v282_v42  ;;  %v1253_v42 = vld [vmem:[%s1703_s3 + $0x144] ss:$8 sps:$4 sm:$0xff]   ;;  %v1256_v44 = vld [vmem:[%s1703_s3 + $0x134] ss:$8 sps:$4 sm:$0xff]  }
 0x108   :  { %v288_v45 = vpop.f32.mrf.mxu0  ;;  %573 = vmatprep.subr.bf16.mxu1 %v1253_v42  ;;  %v681_v42 = vsub.s32 3, %v1513_v54 }
 0x10a   :  { %v292_v46 = vpop.f32.mrf.mxu0 }
 0x10c   :  { %v294_v47 = vpop.f32.mrf.mxu0 }
 0x10e   :  { %v296_v48 = vpop.f32.mrf.mxu0 }
 0x10f   :  { %v302_v49 = vpack.c.bf16 %v296_v48, %v292_v46  ;;  %v1259_v46 = vld [vmem:[%s1703_s3 + $0x124] ss:$8 sps:$4 sm:$0xff]   ;;  %v1262_v48 = vld [vmem:[%s1703_s3 + $0x114] ss:$8 sps:$4 sm:$0xff]  }
 0x110   :  { %v298_v55 = vpop.f32.mrf.mxu0 }
 0x111   :  { %1158 = vmatprep.subr.bf16.mxu0 %v302_v49 }
 0x112   :  { %1159 = vmatpush3.bf16.msra.mxu0 %v302_v49  ;;  %v1264_v49 = vld [vmem:[%s1703_s3 + $0x110] ss:$8 sps:$4 sm:$0xff]  }
 0x113   :  { %1160 = vmatprep.subr.bf16.mxu0 %v301_v50 }
 0x116   :  { %1161 = vmatpush3.bf16.msra.mxu0 %v301_v50  ;;  %v1265_v50 = vld [vmem:[%s1703_s3 + $0x104] ss:$8 sps:$4 sm:$0xff]  }
 0x119   :  { %1163 = vmatmul.mubr.msk.bf16.vlgmr.msra.gmra.mxu0 %vm313_vm0, %v1505_v51 }
 0x11a   :  { %1178 = vmatprep.mubr.msk.bf16.mxu0 %vm313_vm0, %v1483_v36 }
 0x1d9   :  { %v1164_v57 = vpop.f32.mrf.mxu0 }
 0x1da   :  { %v391_v58 = vmul.f32 %v1164_v57, %v1511_v53 }
 0x1db   :  { %v354_v60 = vpop.f32.mrf.mxu0 }
 0x1dc   :  { %v389_v63 = vmul.f32 %v1515_v56, %v354_v60  ;;  %v395_v1 = vadd.f32 %v391_v58, %v294_v47  ;;  %v1261_v47 = vld [vmem:[%s1703_s3 + $0x120] ss:$8 sps:$4 sm:$0xff]  }
 0x1dd   :  { %v1165_v0 = vpop.f32.mrf.mxu0 }
 0x1de   :  { %v393_v2 = vadd.f32 %v389_v63, %v284_v43  ;;  %v392_v3 = vmul.f32 %v1165_v0, %v1519_v61  ;;  %v403_v12 = vadd.f32 %v400_v4, %v395_v1  ;;  %v1255_v43 = vld [vmem:[%s1703_s3 + $0x140] ss:$8 sps:$4 sm:$0xff]  }
 0x1df   :  { %v357_v6 = vpop.f32.mrf.mxu0  ;;  %574 = vmatpush1.bf16.msra.mxu1 %v1255_v43 }
 0x1e0   :  { %v390_v7 = vmul.f32 %v1529_v5, %v357_v6  ;;  %v401_v8 = vadd.f32 %v400_v4, %v393_v2  ;;  %v396_v9 = vadd.f32 %v392_v3, %v298_v55  ;;  %v407_v14 = vmax.f32 %v403_v12, 0.0  ;;  %575 = vmatprep.subr.bf16.mxu1 %v1256_v44 }
 0x1e2   :  { %v394_v10 = vadd.f32 %v390_v7, %v288_v45  ;;  %v405_v11 = vmax.f32 %v401_v8, 0.0  ;;  %v404_v16 = vadd.f32 %v400_v4, %v396_v9  ;;  %v1258_v45 = vld [vmem:[%s1703_s3 + $0x130] ss:$8 sps:$4 sm:$0xff]   ;;  %v455_v7 = vsub.s32 1, %v1513_v54 }
 0x1e3   :  { %576 = vmatpush1.bf16.msra.mxu1 %v1258_v45 }
 0x1e4   :  { %409 = vadd.xlane.f32.xlu0 %v405_v11  ;;  %v402_v13 = vadd.f32 %v400_v4, %v394_v10  ;;  %v408_v17 = vmax.f32 %v404_v16, 0.0  ;;  %577 = vmatprep.subr.bf16.mxu1 %v1259_v46  ;;  %v456_v10 = vrot.slane %v1524_v62, %v455_v7 }
 0x1e6   :  { %v406_v15 = vmax.f32 %v402_v13, 0.0 }
 0x1e7   :  { %578 = vmatpush1.bf16.msra.mxu1 %v1261_v47 }
 0x1e8   :  { %413 = vadd.xlane.f32.xlu0 %v407_v14  ;;  %411 = vadd.xlane.f32.xlu1 %v406_v15 }
 0x1e9   :  { %579 = vmatprep.subr.bf16.mxu1 %v1262_v48 }
 0x1eb   :  { %580 = vmatpush1.bf16.msra.mxu1 %v1264_v49  ;;  %v682_v49 = vrot.slane %v1524_v62, %v681_v42 }
 0x1ec   :  { %415 = vadd.xlane.f32.xlu0 %v408_v17  ;;  %581 = vmatprep.subr.bf16.mxu1 %v1265_v50 }
 0x1ef   :  { %582 = vmatpush1.bf16.msra.mxu1 %v1267_v52 }
 0x26d   :  { %v410_v20 = vpop.xlane.xlu0 %409 }
 0x26e   :  { %v417_v21 = vmul.f32 0.0078125, %v410_v20 }
 0x270   :  { %v1538_v22 = vsub.f32 %v405_v11, %v417_v21  ;;  %v463_v11 = vsub.s32 2, %v1513_v54 }
 0x271   :  { %v414_v23 = vpop.xlane.xlu0 %413  ;;  %v412_v24 = vpop.xlane.xlu1 %411 }
 0x272   :  { %v419_v25 = vmul.f32 0.0078125, %v414_v23  ;;  %v418_v26 = vmul.f32 0.0078125, %v412_v24  ;;  %v425_v27 = vmul.f32 %v1538_v22, %v1538_v22 }
 0x274   :  { %v1542_v28 = vsub.f32 %v407_v14, %v419_v25  ;;  %v422_v29 = vsub.f32 %v406_v15, %v418_v26  ;;  %429 = vadd.xlane.f32.xlu1 %v425_v27  ;;  %v464_v15 = vrot.slane %v1524_v62, %v463_v11 }
 0x275   :  { %v416_v30 = vpop.xlane.xlu0 %415 }
 0x276   :  { %v420_v31 = vmul.f32 0.0078125, %v416_v30  ;;  %v427_v32 = vmul.f32 %v1542_v28, %v1542_v28  ;;  %v426_v33 = vmul.f32 %v422_v29, %v422_v29 }
 0x278   :  { %v1546_v34 = vsub.f32 %v408_v17, %v420_v31  ;;  %433 = vadd.xlane.f32.xlu1 %v427_v32  ;;  %431 = vadd.xlane.f32.xlu0 %v426_v33 }
 0x27a   :  { %v428_v35 = vmul.f32 %v1546_v34, %v1546_v34 }
 0x27c   :  { %435 = vadd.xlane.f32.xlu0 %v428_v35 }
 0x2fd   :  { %v430_v55 = vpop.xlane.xlu1 %429 }
 0x2fe   :  { %v437_v57 = vmul.f32 0.0078125, %v430_v55 }
 0x300   :  { %v441_v58 = vadd.f32 1e-05, %v437_v57 }
 0x301   :  { %v432_v59 = vpop.xlane.xlu0 %431  ;;  %v434_v60 = vpop.xlane.xlu1 %433 }
 0x302   :  { %1292 = vrsqrt.f32 %v441_v58  ;;  %v438_v63 = vmul.f32 0.0078125, %v432_v59  ;;  %v439_v0 = vmul.f32 0.0078125, %v434_v60 }
 0x304   :  { %v442_v1 = vadd.f32 1e-05, %v438_v63  ;;  %v443_v2 = vadd.f32 1e-05, %v439_v0 }
 0x305   :  { %v436_v3 = vpop.xlane.xlu0 %435 }
 0x306   :  { %1294 = vrsqrt.f32 %v442_v1  ;;  %v440_v4 = vmul.f32 0.0078125, %v436_v3 }
 0x307   :  { %1296 = vrsqrt.f32 %v443_v2 }
 0x308   :  { %v444_v6 = vadd.f32 1e-05, %v440_v4 }
 0x30a   :  { %1298 = vrsqrt.f32 %v444_v6 }
 0x30f   :  { %v1293_v8 = vpop.eup %1292 }
 0x310   :  { %v449_v9 = vmul.f32 %v1293_v8, %v1538_v22 }
 0x312   :  { %v457_v14 = vmul.f32 %v456_v10, %v449_v9 }
 0x313   :  { %v1295_v12 = vpop.eup %1294 }
 0x314   :  { %v450_v13 = vmul.f32 %v1295_v12, %v422_v29  ;;  %v1297_v16 = vpop.eup %1296  ;;  %v465_v19 = vadd.f32 %v464_v15, %v457_v14 }
 0x315   :  { %v451_v21 = vmul.f32 %v1297_v16, %v1542_v28 }
 0x316   :  { %v458_v17 = vmul.f32 %v456_v10, %v450_v13 }
 0x317   :  { %v1299_v18 = vpop.eup %1298  ;;  %v459_v25 = vmul.f32 %v456_v10, %v451_v21  ;;  %v1270_v21 = vld [vmem:[%s1703_s3 + $0x1f4] ss:$8 sps:$4 sm:$0xff]  }
 0x318   :  { %v466_v20 = vadd.f32 %v464_v15, %v458_v17  ;;  %v452_v23 = vmul.f32 %v1299_v18, %v1546_v34 }
 0x319   :  { %v467_v27 = vadd.f32 %v464_v15, %v459_v25  ;;  %v1276_v25 = vld [vmem:[%s1703_s3 + $0x1d4] ss:$8 sps:$4 sm:$0xff]  }
 0x31a   :  { %v469_v24 = vpack.c.bf16 %v466_v20, %v465_v19  ;;  %v460_v22 = vmul.f32 %v456_v10, %v452_v23  ;;  %v1268_v23 = vld [vmem:[%s1703_s3 + $0x1f0] ss:$8 sps:$4 sm:$0xff]  }
 0x31c   :  { %600 = vmatmul.mubr.bf16.vlgmr.msra.gmra.mxu1 %v469_v24  ;;  %v468_v26 = vadd.f32 %v464_v15, %v460_v22  ;;  %v1273_v24 = vld [vmem:[%s1703_s3 + $0x1e4] ss:$8 sps:$4 sm:$0xff]   ;;  %v1271_v22 = vld [vmem:[%s1703_s3 + $0x1e0] ss:$8 sps:$4 sm:$0xff]  }
 0x31d   :  { %609 = vmatprep.mubr.bf16.mxu1 %v1338_v39 }
 0x31e   :  { %v470_v29 = vpack.c.bf16 %v468_v26, %v467_v27  ;;  %v1274_v26 = vld [vmem:[%s1703_s3 + $0x1d0] ss:$8 sps:$4 sm:$0xff]   ;;  %v1279_v27 = vld [vmem:[%s1703_s3 + $0x1c4] ss:$8 sps:$4 sm:$0xff]  }
 0x324   :  { %610 = vmatmul.mubr.bf16.gmra.mxu1 %v470_v29  ;;  %v1277_v29 = vld [vmem:[%s1703_s3 + $0x1c0] ss:$8 sps:$4 sm:$0xff]  }
 0x325   :  { %1170 = vmatprep.mubr.msk.bf16.mxu1 %vm313_vm0, %v1483_v36 }
 0x3dc   :  { %v601_v30 = vpop.f32.mrf.mxu1 }
 0x3de   :  { %v603_v31 = vpop.f32.mrf.mxu1 }
 0x3e0   :  { %v605_v32 = vpop.f32.mrf.mxu1 }
 0x3e1   :  { %v620_v38 = vpack.c.bf16 %v605_v32, %v601_v30  ;;  %v1280_v30 = vld [vmem:[%s1703_s3 + $0x1b0] ss:$8 sps:$4 sm:$0xff]   ;;  %v1285_v32 = vld [vmem:[%s1703_s3 + $0x1a4] ss:$8 sps:$4 sm:$0xff]  }
 0x3e2   :  { %v607_v33 = vpop.f32.mrf.mxu1 }
 0x3e4   :  { %v611_v28 = vpop.f32.mrf.mxu1 }
 0x3e6   :  { %v613_v35 = vpop.f32.mrf.mxu1 }
 0x3e8   :  { %v615_v34 = vpop.f32.mrf.mxu1 }
 0x3e9   :  { %v621_v37 = vpack.c.bf16 %v615_v34, %v611_v28  ;;  %v1288_v28 = vld [vmem:[%s1703_s3 + $0x194] ss:$8 sps:$4 sm:$0xff]   ;;  %v1291_v34 = vld [vmem:[%s1703_s3 + $0x184] ss:$8 sps:$4 sm:$0xff]  }
 0x3ea   :  { %v617_v40 = vpop.f32.mrf.mxu1 }
 0x3eb   :  { %1166 = vmatprep.subr.bf16.mxu1 %v621_v37 }
 0x3ec   :  { %1167 = vmatpush3.bf16.msra.mxu1 %v621_v37  ;;  %v1289_v37 = vld [vmem:[%s1703_s3 + $0x180] ss:$8 sps:$4 sm:$0xff]  }
 0x3ed   :  { %1168 = vmatprep.subr.bf16.mxu1 %v620_v38 }
 0x3f0   :  { %1169 = vmatpush3.bf16.msra.mxu1 %v620_v38 }
 0x3f1   :  { %857 = vmatprep.subr.bf16.mxu1 %v1270_v21 }
 0x3f3   :  { %1171 = vmatmul.mubr.msk.bf16.vlgmr.msra.gmra.mxu1 %vm313_vm0, %v1505_v51 }
 0x3f4   :  { %889 = vmatprep.mubr.bf16.mxu1 %v1338_v39  ;;  %858 = vmatpush1.bf16.msra.mxu1 %v1268_v23 }
 0x3f5   :  { %859 = vmatprep.subr.bf16.mxu1 %v1273_v24 }
 0x3f8   :  { %860 = vmatpush1.bf16.msra.mxu1 %v1271_v22 }
 0x3f9   :  { %861 = vmatprep.subr.bf16.mxu1 %v1276_v25 }
 0x3fc   :  { %862 = vmatpush1.bf16.msra.mxu1 %v1274_v26 }
 0x3fd   :  { %863 = vmatprep.subr.bf16.mxu1 %v1279_v27 }
 0x400   :  { %864 = vmatpush1.bf16.msra.mxu1 %v1277_v29 }
 0x4b3   :  { %v1172_v36 = vpop.f32.mrf.mxu1 }
 0x4b4   :  { %v673_v41 = vmul.f32 %v1172_v36, %v1511_v53 }
 0x4b5   :  { %v656_v43 = vpop.f32.mrf.mxu1 }
 0x4b6   :  { %v671_v44 = vmul.f32 %v656_v43, %v1515_v56  ;;  %v677_v46 = vadd.f32 %v673_v41, %v613_v35  ;;  %v1286_v35 = vld [vmem:[%s1703_s3 + $0x190] ss:$8 sps:$4 sm:$0xff]  }
 0x4b7   :  { %v1173_v45 = vpop.f32.mrf.mxu1 }
 0x4b8   :  { %v675_v47 = vadd.f32 %v671_v44, %v603_v31  ;;  %v674_v48 = vmul.f32 %v1173_v45, %v1519_v61  ;;  %v685_v60 = vadd.f32 %v682_v49, %v677_v46  ;;  %v1282_v31 = vld [vmem:[%s1703_s3 + $0x1b4] ss:$8 sps:$4 sm:$0xff]  }
 0x4b9   :  { %v659_v50 = vpop.f32.mrf.mxu1  ;;  %865 = vmatprep.subr.bf16.mxu1 %v1282_v31 }
 0x4ba   :  { %v672_v52 = vmul.f32 %v659_v50, %v1529_v5  ;;  %v683_v55 = vadd.f32 %v682_v49, %v675_v47  ;;  %v678_v57 = vadd.f32 %v674_v48, %v617_v40  ;;  %v689_v0 = vmax.f32 %v685_v60, 0.0  ;;  %866 = vmatpush1.bf16.msra.mxu1 %v1280_v30 }
 0x4bb   :  { %867 = vmatprep.subr.bf16.mxu1 %v1285_v32 }
 0x4bc   :  { %v676_v58 = vadd.f32 %v672_v52, %v607_v33  ;;  %v687_v59 = vmax.f32 %v683_v55, 0.0  ;;  %v686_v2 = vadd.f32 %v682_v49, %v678_v57  ;;  %v1283_v33 = vld [vmem:[%s1703_s3 + $0x1a0] ss:$8 sps:$4 sm:$0xff]  }
 0x4be   :  { %691 = vadd.xlane.f32.xlu1 %v687_v59  ;;  %v684_v63 = vadd.f32 %v682_v49, %v676_v58  ;;  %v690_v3 = vmax.f32 %v686_v2, 0.0  ;;  %868 = vmatpush1.bf16.msra.mxu1 %v1283_v33 }
 0x4bf   :  { %869 = vmatprep.subr.bf16.mxu1 %v1288_v28  ;;  %v971_v28 = vsub.s32 6, %v1513_v54 }
 0x4c0   :  { %v688_v1 = vmax.f32 %v684_v63, 0.0 }
 0x4c2   :  { %695 = vadd.xlane.f32.xlu1 %v689_v0  ;;  %693 = vadd.xlane.f32.xlu0 %v688_v1 }
 0x4c3   :  { %870 = vmatpush1.bf16.msra.mxu1 %v1286_v35 }
 0x4c4   :  { %871 = vmatprep.subr.bf16.mxu1 %v1291_v34 }
 0x4c6   :  { %697 = vadd.xlane.f32.xlu0 %v690_v3 }
 0x4c7   :  { %872 = vmatpush1.bf16.msra.mxu1 %v1289_v37 }
 0x547   :  { %v692_v4 = vpop.xlane.xlu1 %691 }
 0x548   :  { %v699_v6 = vmul.f32 0.015625, %v692_v4  ;;  %v753_v4 = vsub.s32 5, %v1513_v54 }
 0x54a   :  { %v1611_v7 = vsub.f32 %v687_v59, %v699_v6  ;;  %v723_v40 = vmul.f32 %v699_v6, %v699_v6 }
 0x54b   :  { %v696_v8 = vpop.xlane.xlu1 %695  ;;  %v694_v9 = vpop.xlane.xlu0 %693 }
 0x54c   :  { %v701_v10 = vmul.f32 0.015625, %v696_v8  ;;  %v700_v11 = vmul.f32 0.015625, %v694_v9  ;;  %v707_v12 = vmul.f32 %v1611_v7, %v1611_v7 }
 0x54e   :  { %v1615_v13 = vsub.f32 %v689_v0, %v701_v10  ;;  %v1617_v14 = vsub.f32 %v688_v1, %v700_v11  ;;  %711 = vadd.xlane.f32.xlu1 %v707_v12  ;;  %v725_v42 = vmul.f32 %v701_v10, %v701_v10  ;;  %v724_v45 = vmul.f32 %v700_v11, %v700_v11 }
 0x54f   :  { %v698_v15 = vpop.xlane.xlu0 %697  ;;  %v745_v0 = vsub.s32 4, %v1513_v54  ;;  %v754_v12 = vrot.slane %v1524_v62, %v753_v4 }
 0x550   :  { %v702_v16 = vmul.f32 0.015625, %v698_v15  ;;  %v709_v17 = vmul.f32 %v1615_v13, %v1615_v13  ;;  %v708_v18 = vmul.f32 %v1617_v14, %v1617_v14 }
 0x552   :  { %v1623_v19 = vsub.f32 %v690_v3, %v702_v16  ;;  %715 = vadd.xlane.f32.xlu1 %v709_v17  ;;  %713 = vadd.xlane.f32.xlu0 %v708_v18  ;;  %v726_v55 = vmul.f32 %v702_v16, %v702_v16  ;;  %v746_v3 = vrot.slane %v1524_v62, %v745_v0 }
 0x554   :  { %v710_v20 = vmul.f32 %v1623_v19, %v1623_v19 }
 0x556   :  { %717 = vadd.xlane.f32.xlu0 %v710_v20 }
 0x5d7   :  { %v712_v38 = vpop.xlane.xlu1 %711 }
 0x5d8   :  { %v719_v36 = vmul.f32 0.015625, %v712_v38 }
 0x5da   :  { %v727_v41 = vsub.f32 %v719_v36, %v723_v40 }
 0x5db   :  { %v716_v43 = vpop.xlane.xlu1 %715  ;;  %v714_v44 = vpop.xlane.xlu0 %713 }
 0x5dc   :  { %v731_v46 = vadd.f32 1e-05, %v727_v41  ;;  %v721_v47 = vmul.f32 0.015625, %v716_v43  ;;  %v720_v48 = vmul.f32 0.015625, %v714_v44  ;;  %v972_v41 = vrot.slane %v1524_v62, %v971_v28 }
 0x5de   :  { %1300 = vrsqrt.f32 %v731_v46  ;;  %v729_v49 = vsub.f32 %v721_v47, %v725_v42  ;;  %v728_v50 = vsub.f32 %v720_v48, %v724_v45 }
 0x5df   :  { %v718_v52 = vpop.xlane.xlu0 %717 }
 0x5e0   :  { %v733_v57 = vadd.f32 1e-05, %v729_v49  ;;  %v732_v58 = vadd.f32 1e-05, %v728_v50  ;;  %v722_v59 = vmul.f32 0.015625, %v718_v52 }
 0x5e2   :  { %1302 = vrsqrt.f32 %v733_v57  ;;  %v730_v60 = vsub.f32 %v722_v59, %v726_v55 }
 0x5e3   :  { %1304 = vrsqrt.f32 %v732_v58 }
 0x5e4   :  { %v734_v63 = vadd.f32 1e-05, %v730_v60 }
 0x5e6   :  { %1306 = vrsqrt.f32 %v734_v63 }
 0x5eb   :  { %v1301_v1 = vpop.eup %1300 }
 0x5ec   :  { %v739_v2 = vmul.f32 %v1301_v1, %v1611_v7 }
 0x5ee   :  { %v747_v11 = vmul.f32 %v746_v3, %v739_v2 }
 0x5ef   :  { %v1303_v6 = vpop.eup %1302 }
 0x5f0   :  { %v1305_v8 = vpop.eup %1304  ;;  %v741_v9 = vmul.f32 %v1303_v6, %v1615_v13  ;;  %v755_v20 = vadd.f32 %v754_v12, %v747_v11 }
 0x5f1   :  { %v740_v10 = vmul.f32 %v1305_v8, %v1617_v14 }
 0x5f2   :  { %v749_v18 = vmul.f32 %v746_v3, %v741_v9 }
 0x5f3   :  { %v1307_v15 = vpop.eup %1306  ;;  %v748_v16 = vmul.f32 %v746_v3, %v740_v10 }
 0x5f4   :  { %v742_v17 = vmul.f32 %v1307_v15, %v1623_v19  ;;  %v757_v24 = vadd.f32 %v754_v12, %v749_v18 }
 0x5f5   :  { %v756_v7 = vadd.f32 %v754_v12, %v748_v16 }
 0x5f6   :  { %v750_v21 = vmul.f32 %v746_v3, %v742_v17 }
 0x5f7   :  { %v759_v23 = vpack.c.bf16 %v756_v7, %v755_v20 }
 0x5f8   :  { %v758_v22 = vadd.f32 %v754_v12, %v750_v21 }
 0x5f9   :  { %890 = vmatmul.mubr.bf16.vlgmr.msra.gmra.mxu1 %v759_v23 }
 0x5fa   :  { %899 = vmatprep.mubr.bf16.mxu1 %v1338_v39  ;;  %v760_v13 = vpack.c.bf16 %v758_v22, %v757_v24 }
 0x601   :  { %900 = vmatmul.mubr.bf16.gmra.mxu1 %v760_v13 }
 0x6b9   :  { %v891_v14 = vpop.f32.mrf.mxu1 }
 0x6bb   :  { %v893_v25 = vpop.f32.mrf.mxu1 }
 0x6bd   :  { %v895_v26 = vpop.f32.mrf.mxu1 }
 0x6be   :  { %v910_v32 = vpack.c.bf16 %v895_v26, %v891_v14 }
 0x6bf   :  { %v897_v27 = vpop.f32.mrf.mxu1 }
 0x6c1   :  { %v901_v29 = vpop.f32.mrf.mxu1 }
 0x6c3   :  { %v903_v30 = vpop.f32.mrf.mxu1 }
 0x6c5   :  { %v905_v31 = vpop.f32.mrf.mxu1 }
 0x6c6   :  { %v911_v19 = vpack.c.bf16 %v905_v31, %v901_v29  ;;  %v1035_v31 = vsub.s32 7, %v1513_v54 }
 0x6c8   :  { %1174 = vmatprep.subr.bf16.mxu0 %v911_v19 }
 0x6c9   :  { %1175 = vmatpush3.bf16.msra.mxu0 %v911_v19  ;;  %v1036_v19 = vrot.slane %v1524_v62, %v1035_v31 }
 0x6ca   :  { %1176 = vmatprep.subr.bf16.mxu0 %v910_v32 }
 0x6cd   :  { %1177 = vmatpush3.bf16.msra.mxu0 %v910_v32 }
 0x6d0   :  { %1179 = vmatmul.mubr.msk.bf16.vlgmr.msra.gmra.mxu0 %vm313_vm0, %v1505_v51  ;;  %v907_v51 = vpop.f32.mrf.mxu1 }
 0x790   :  { %v1180_v33 = vpop.f32.mrf.mxu0 }
 0x791   :  { %v963_v39 = vmul.f32 %v1180_v33, %v1511_v53 }
 0x792   :  { %v946_v35 = vpop.f32.mrf.mxu0 }
 0x793   :  { %v961_v34 = vmul.f32 %v946_v35, %v1515_v56  ;;  %v967_v38 = vadd.f32 %v963_v39, %v903_v30  ;;  %v1145_v39 = vld [vmem:[%s1704_s4 + $0x8] ss:$0 sm:$0xff]  ;;  %s1316_s4 = scalar_lea.vmem %s1059_s11, 512 }
 0x794   :  { %v1181_v37 = vpop.f32.mrf.mxu0  ;;  %p1317_p0 = scmp.ne.s32.totalorder %s1059_s11, %s1316_s4  ;;  %p1322_p2 = scmp.lt.s32.totalorder %s1316_s4, %s1316_s4 }
 0x795   :  { %v965_v40 = vadd.f32 %v961_v34, %v893_v25  ;;  %v964_v36 = vmul.f32 %v1181_v37, %v1519_v61  ;;  %v975_v47 = vadd.f32 %v972_v41, %v967_v38 }
 0x796   :  { %v949_v42 = vpop.f32.mrf.mxu0  ;;  %p1323_p3 = por %p1322_p2, %p1321_p1 }
 0x797   :  { %v962_v43 = vmul.f32 %v949_v42, %v1529_v5  ;;  %v973_v44 = vadd.f32 %v972_v41, %v965_v40  ;;  %v968_v45 = vadd.f32 %v964_v36, %v907_v51  ;;  %v979_v49 = vmax.f32 %v975_v47, 0.0 }
 0x798   :  { %p1324_p4 = pnand %p1323_p3, %p1317_p0 }
 0x799   :  { %v966_v46 = vadd.f32 %v962_v43, %v897_v27  ;;  %v977_v53 = vmax.f32 %v973_v44, 0.0  ;;  %v976_v50 = vadd.f32 %v972_v41, %v968_v45 }
 0x79b   :  { %981 = vadd.xlane.f32.xlu1 %v977_v53  ;;  %v974_v48 = vadd.f32 %v972_v41, %v966_v46  ;;  %v980_v52 = vmax.f32 %v976_v50, 0.0 }
 0x79d   :  { %v978_v56 = vmax.f32 %v974_v48, 0.0 }
 0x79f   :  { %985 = vadd.xlane.f32.xlu1 %v979_v49  ;;  %983 = vadd.xlane.f32.xlu0 %v978_v56 }
 0x7a3   :  { %987 = vadd.xlane.f32.xlu0 %v980_v52 }
 0x824   :  { %v982_v61 = vpop.xlane.xlu1 %981 }
 0x825   :  { %v989_v55 = vmul.f32 0.015625, %v982_v61 }
 0x827   :  { %v993_v57 = vsub.f32 %v977_v53, %v989_v55  ;;  %v1013_v11 = vmul.f32 %v989_v55, %v989_v55 }
 0x828   :  { %v986_v58 = vpop.xlane.xlu1 %985  ;;  %v984_v5 = vpop.xlane.xlu0 %983 }
 0x829   :  { %v991_v59 = vmul.f32 0.015625, %v986_v58  ;;  %v990_v60 = vmul.f32 0.015625, %v984_v5  ;;  %v997_v63 = vmul.f32 %v993_v57, %v993_v57 }
 0x82b   :  { %v995_v0 = vsub.f32 %v979_v49, %v991_v59  ;;  %v994_v1 = vsub.f32 %v978_v56, %v990_v60  ;;  %1001 = vadd.xlane.f32.xlu1 %v997_v63  ;;  %v1015_v16 = vmul.f32 %v991_v59, %v991_v59  ;;  %v1014_v20 = vmul.f32 %v990_v60, %v990_v60 }
 0x82c   :  { %v988_v2 = vpop.xlane.xlu0 %987 }
 0x82d   :  { %v992_v3 = vmul.f32 0.015625, %v988_v2  ;;  %v999_v4 = vmul.f32 %v995_v0, %v995_v0  ;;  %v998_v6 = vmul.f32 %v994_v1, %v994_v1 }
 0x82f   :  { %v996_v8 = vsub.f32 %v980_v52, %v992_v3  ;;  %1005 = vadd.xlane.f32.xlu1 %v999_v4  ;;  %1003 = vadd.xlane.f32.xlu0 %v998_v6  ;;  %v1016_v14 = vmul.f32 %v992_v3, %v992_v3 }
 0x831   :  { %v1000_v9 = vmul.f32 %v996_v8, %v996_v8 }
 0x833   :  { %1007 = vadd.xlane.f32.xlu0 %v1000_v9 }
 0x8b4   :  { %v1002_v10 = vpop.xlane.xlu1 %1001 }
 0x8b5   :  { %v1009_v12 = vmul.f32 0.015625, %v1002_v10 }
 0x8b7   :  { %v1017_v15 = vsub.f32 %v1009_v12, %v1013_v11 }
 0x8b8   :  { %v1006_v17 = vpop.xlane.xlu1 %1005  ;;  %v1004_v18 = vpop.xlane.xlu0 %1003 }
 0x8b9   :  { %v1021_v7 = vadd.f32 1e-05, %v1017_v15  ;;  %v1011_v21 = vmul.f32 0.015625, %v1006_v17  ;;  %v1010_v23 = vmul.f32 0.015625, %v1004_v18 }
 0x8bb   :  { %1308 = vrsqrt.f32 %v1021_v7  ;;  %v1019_v24 = vsub.f32 %v1011_v21, %v1015_v16  ;;  %v1018_v22 = vsub.f32 %v1010_v23, %v1014_v20 }
 0x8bc   :  { %v1008_v13 = vpop.xlane.xlu0 %1007 }
 0x8bd   :  { %v1023_v25 = vadd.f32 1e-05, %v1019_v24  ;;  %v1022_v26 = vadd.f32 1e-05, %v1018_v22  ;;  %v1012_v27 = vmul.f32 0.015625, %v1008_v13 }
 0x8bf   :  { %1310 = vrsqrt.f32 %v1023_v25  ;;  %v1020_v29 = vsub.f32 %v1012_v27, %v1016_v14 }
 0x8c0   :  { %1312 = vrsqrt.f32 %v1022_v26 }
 0x8c1   :  { %v1024_v30 = vadd.f32 1e-05, %v1020_v29 }
 0x8c3   :  { %1314 = vrsqrt.f32 %v1024_v30 }
 0x8c8   :  { %v1309_v32 = vpop.eup %1308 }
 0x8c9   :  { %v1029_v33 = vmul.f32 %v1309_v32, %v993_v57 }
 0x8cb   :  { %v1037_v28 = vmul.f32 %v1036_v19, %v1029_v33 }
 0x8cc   :  { %v1311_v35 = vpop.eup %1310 }
 0x8cd   :  { %v1313_v34 = vpop.eup %1312  ;;  %v1031_v37 = vmul.f32 %v1311_v35, %v995_v0  ;;  %v1045_v38 = vadd.f32 %v1145_v39, %v1037_v28 }
 0x8ce   :  { %v1030_v40 = vmul.f32 %v1313_v34, %v994_v1 }
 0x8cf   :  { %v1039_v36 = vmul.f32 %v1036_v19, %v1031_v37  ;;  %1049 = vst [vmem:[#allocation2] sm:$0xff] %v1045_v38 }
 0x8d0   :  { %v1315_v41 = vpop.eup %1314  ;;  %v1038_v42 = vmul.f32 %v1036_v19, %v1030_v40 }
 0x8d1   :  { %v1032_v43 = vmul.f32 %v1315_v41, %v996_v8  ;;  %v1047_v54 = vadd.f32 %v1145_v39, %v1039_v36 }
 0x8d2   :  { %v1046_v44 = vadd.f32 %v1145_v39, %v1038_v42 }
 0x8d3   :  { %v1040_v62 = vmul.f32 %v1036_v19, %v1032_v43  ;;  %1051 = vst [vmem:[#allocation2 + $0x10] sm:$0xff] %v1047_v54 }
 0x8d4   :  { %1050 = vst [vmem:[#allocation2 + $0x8] sm:$0xff] %v1046_v44 }
 0x8d5   :  { %v1048_v51 = vadd.f32 %v1145_v39, %v1040_v62 }
 0x8d7   :  { %1052 = vst [vmem:[#allocation2 + $0x18] sm:$0xff] %v1048_v51 }
 0x8d8   :  { %1327 = shalt.err (!%p1324_p4)
}
 0x8d9   :  { %s1340_s12 = smov 128   ;;  %s1341_s13 = smov 8  }
 0x8da   :  { %1064 = dma.vmem_to_hbm [thread:$0]  %s1059_s11, 512, %s1705_s5, [#allocation3], %s1340_s12, %s1340_s12, %s1341_s13  }
 0x8db   :  { %1336 = dma.done.wait [#allocation3], 512  }
 0x8dc   :  { %1337 = vsyncadd [#allocation3], 4294966784 }
 0x8dd   :  { %1068 = vsyncpa [#allocation3], 1 }

</bundles_post_ra>
